<compile_context>
chip_gen: v5e
topology: v5e:2x2
jax: 0.10.0
libtpu: 0.0.40
codegen_flags: <defaults>
</compile_context>

<pallas_src>
import functools

import jax
import jax.numpy as jnp
from jax.experimental import pallas as pl
from jax.experimental.pallas import tpu as pltpu

SMEM = pltpu.MemorySpace.SMEM

TILE_ROWS = 128   # row tile for the fused pointwise MLP kernels
TILE_Q = 128      # query-row tile for the flash cross-saliency kernel
TILE_K = 128      # key/value tile for the flash cross-saliency kernel


def _round_up(n, m):
    return ((n + m - 1) // m) * m


def _pad_rows(x, n_pad):
    n = x.shape[0]
    if n == n_pad:
        return x
    return jnp.pad(x, ((0, n_pad - n), (0, 0)))


def _wspec(shape):
    # resident whole-array VMEM block (weights / biases), constant index_map
    return pl.BlockSpec(shape, lambda i: (0, 0))


# ----------------------------------------------------------------------------
# Kernel 1: fused pointwise encoder chain
#   enc unary (LeakyReLU 0.1) -> bottle (1x1 conv) -> [GNN identity]
#   -> composed proj_gnn/proj_score
#   outputs: packed [raw feats | score]  and  L2-normalized feats (bf16)
# ----------------------------------------------------------------------------
def _encoder_mlp_kernel(x_ref, enc_w_ref, enc_b_ref, bot_w_ref, bot_b_ref,
                        proj_w_ref, proj_b_ref,
                        packed_ref, norm_ref, *, gnn_dim):
    x = x_ref[...]
    h = jnp.dot(x, enc_w_ref[...], preferred_element_type=jnp.float32)
    h = h + enc_b_ref[...]
    h = jnp.where(h >= 0.0, h, 0.1 * h)                       # LeakyReLU(0.1)

    g = jnp.dot(h, bot_w_ref[...], preferred_element_type=jnp.float32)
    g = g + bot_b_ref[...]

    # TODO(synk): GCN self/cross attention submodule not provided — identity.

    # proj_gnn and (composed) proj_score fused into a single [G, G+1] matmul.
    pg = jnp.dot(g, proj_w_ref[...], preferred_element_type=jnp.float32)
    pg = pg + proj_b_ref[...]
    packed_ref[...] = pg                                      # [feats | score]

    feats = pg[:, :gnn_dim]
    ss = jnp.sum(feats * feats, axis=1, keepdims=True)
    inv_norm = jax.lax.rsqrt(jnp.maximum(ss, 1e-24))          # EUP rsqrt
    norm_ref[...] = (feats * inv_norm).astype(norm_ref.dtype)  # bf16 for MXU


def _encoder_mlp(features, enc_w, enc_b, bot_w, bot_b, proj_w, proj_b, gnn_dim):
    n, c_in = features.shape
    n_pad = _round_up(n, TILE_ROWS)
    x = _pad_rows(features.astype(jnp.float32), n_pad)
    row = lambda c: pl.BlockSpec((TILE_ROWS, c), lambda i: (i, 0))
    out_shapes = (
        jax.ShapeDtypeStruct((n_pad, gnn_dim + 1), jnp.float32),  # [feats|score]
        jax.ShapeDtypeStruct((n_pad, gnn_dim), jnp.bfloat16),     # normed feats
    )
    return pl.pallas_call(
        functools.partial(_encoder_mlp_kernel, gnn_dim=gnn_dim),
        out_shape=out_shapes,
        grid=(n_pad // TILE_ROWS,),
        in_specs=[row(c_in),
                  _wspec(enc_w.shape), _wspec(enc_b.shape),
                  _wspec(bot_w.shape), _wspec(bot_b.shape),
                  _wspec(proj_w.shape), _wspec(proj_b.shape)],
        out_specs=(row(gnn_dim + 1), row(gnn_dim)),
        compiler_params=pltpu.CompilerParams(dimension_semantics=("parallel",)),
    )(x, enc_w, enc_b, bot_w, bot_b, proj_w, proj_b)


# ----------------------------------------------------------------------------
# Kernel 2: flash-style tiled cross-saliency scores
#   out = softmax(q_norm @ k_norm.T / T, dim=1) @ v_scores
# online softmax over KV tiles; padded KV columns masked to -inf.
# ----------------------------------------------------------------------------
def _flash_scores_kernel(q_ref, k_ref, v_ref, temp_ref, o_ref,
                         m_sc, l_sc, acc_sc, *, n_kv, tile_k):
    ki = pl.program_id(1)

    @pl.when(ki == 0)
    def _():
        m_sc[...] = jnp.full_like(m_sc, -jnp.inf)
        l_sc[...] = jnp.zeros_like(l_sc)
        acc_sc[...] = jnp.zeros_like(acc_sc)

    inv_t = 1.0 / temp_ref[0]
    # bf16 x bf16 MXU matmul with f32 accumulation; contraction over feature
    # dim of both operands (no explicit transpose of k).
    s = jax.lax.dot_general(q_ref[...], k_ref[...],
                            (((1,), (1,)), ((), ())),
                            preferred_element_type=jnp.float32)
    s = s * inv_t

    if n_kv % tile_k != 0:  # static: mask padded KV columns
        col = ki * tile_k + jax.lax.broadcasted_iota(jnp.int32, s.shape, 1)
        s = jnp.where(col < n_kv, s, -jnp.inf)

    m_prev = m_sc[...]
    m_new = jnp.maximum(m_prev, jnp.max(s, axis=1, keepdims=True))
    alpha = jnp.exp(m_prev - m_new)
    p = jnp.exp(s - m_new)                                      # f32 softmax math
    l_sc[...] = alpha * l_sc[...] + jnp.sum(p, axis=1, keepdims=True)
    acc_sc[...] = alpha * acc_sc[...] + jnp.dot(
        p, v_ref[...], preferred_element_type=jnp.float32)
    m_sc[...] = m_new

    @pl.when(ki == pl.num_programs(1) - 1)
    def _():
        o_ref[...] = acc_sc[...] * pl.reciprocal(l_sc[...], approx=True)


def flash_cross_scores(q_norm, k_norm, v_scores, temperature):
    nq, g = q_norm.shape
    nk = k_norm.shape[0]
    nq_pad = _round_up(nq, TILE_Q)
    nk_pad = _round_up(nk, TILE_K)
    q = _pad_rows(q_norm, nq_pad)
    k = _pad_rows(k_norm, nk_pad)
    v = _pad_rows(v_scores, nk_pad)
    temp = jnp.reshape(temperature.astype(jnp.float32), (1,))
    out = pl.pallas_call(
        functools.partial(_flash_scores_kernel, n_kv=nk, tile_k=TILE_K),
        out_shape=jax.ShapeDtypeStruct((nq_pad, 1), jnp.float32),
        grid=(nq_pad // TILE_Q, nk_pad // TILE_K),
        in_specs=[pl.BlockSpec((TILE_Q, g), lambda qi, ki: (qi, 0)),
                  pl.BlockSpec((TILE_K, g), lambda qi, ki: (ki, 0)),
                  pl.BlockSpec((TILE_K, 1), lambda qi, ki: (ki, 0)),
                  pl.BlockSpec(memory_space=SMEM)],
        out_specs=pl.BlockSpec((TILE_Q, 1), lambda qi, ki: (qi, 0)),
        scratch_shapes=[pltpu.VMEM((TILE_Q, 1), jnp.float32),   # running max
                        pltpu.VMEM((TILE_Q, 1), jnp.float32),   # running denom
                        pltpu.VMEM((TILE_Q, 1), jnp.float32)],  # accumulator
        compiler_params=pltpu.CompilerParams(
            dimension_semantics=("parallel", "arbitrary")),
    )(q, k, v, temp)
    return out[:nq]


# ----------------------------------------------------------------------------
# Kernel 3: fused decoder chain (dec1 unary -> dec2 last_unary -> heads)
#   dec1 input concat [scores_c, scores_saliency, feats_gnn_raw] is replaced by
#   the packed [feats | scores_c] encoder output (single [G+1]-wide matmul with
#   reordered dec1 rows) plus a rank-1 broadcast for the saliency column, so
#   the 34-wide concat array is never materialized.
# ----------------------------------------------------------------------------
def _decoder_mlp_kernel(featsc_ref, sal_ref,
                        w_fc_ref, w_sal_ref, b1_ref, w2_ref, b2_ref,
                        feats_out_ref, scores_out_ref, *, final_dim):
    h = (jnp.dot(featsc_ref[...], w_fc_ref[...],
                 preferred_element_type=jnp.float32)
         + sal_ref[...] * w_sal_ref[...]        # [T,1]*[1,E] rank-1 broadcast
         + b1_ref[...])
    h = jnp.where(h >= 0.0, h, 0.1 * h)                        # LeakyReLU(0.1)

    y = jnp.dot(h, w2_ref[...], preferred_element_type=jnp.float32)
    y = y + b2_ref[...]

    feats = y[:, :final_dim]
    sc = y[:, final_dim:final_dim + 2]                         # [overlap, saliency]

    s = 1.0 / (1.0 + jnp.exp(-sc))                             # sigmoid
    s = jnp.clip(s, 0.0, 1.0)                                  # clamp
    s = jnp.where(s != s, jnp.zeros_like(s), s)                # isnan -> 0
    s = jnp.where(jnp.abs(s) == jnp.inf, jnp.zeros_like(s), s)  # isinf -> 0
    scores_out_ref[...] = s

    ss = jnp.sum(feats * feats, axis=1, keepdims=True)
    feats_out_ref[...] = feats * jax.lax.rsqrt(jnp.maximum(ss, 1e-24))


def _decoder_mlp(feats_scores_packed, scores_sal_padded,
                 dec1_w, dec1_b, dec2_w, dec2_b, final_dim):
    n_pad, gp1 = feats_scores_packed.shape          # gp1 = gnn_dim + 1
    # Reorder dec1 rows to match the packed [feats | scores_c] layout:
    #   original concat order is [scores_c, scores_saliency, feats...].
    w_fc = jnp.concatenate([dec1_w[2:, :], dec1_w[0:1, :]], axis=0)  # [G+1, E]
    w_sal = dec1_w[1:2, :]
    row = lambda c: pl.BlockSpec((TILE_ROWS, c), lambda i: (i, 0))
    out_shapes = (
        jax.ShapeDtypeStruct((n_pad, final_dim), jnp.float32),  # feats_f
        jax.ShapeDtypeStruct((n_pad, 2), jnp.float32),          # packed scores
    )
    return pl.pallas_call(
        functools.partial(_decoder_mlp_kernel, final_dim=final_dim),
        out_shape=out_shapes,
        grid=(n_pad // TILE_ROWS,),
        in_specs=[row(gp1), row(1),
                  _wspec(w_fc.shape), _wspec(w_sal.shape),
                  _wspec(dec1_b.shape), _wspec(dec2_w.shape), _wspec(dec2_b.shape)],
        out_specs=(row(final_dim), row(2)),
        compiler_params=pltpu.CompilerParams(dimension_semantics=("parallel",)),
    )(feats_scores_packed, scores_sal_padded, w_fc, w_sal, dec1_b, dec2_w, dec2_b)


# ----------------------------------------------------------------------------
# KPFCNN forward (glue in plain JAX; compute in the Pallas kernels above)
# ----------------------------------------------------------------------------
def kpfcnn_forward(params, features, len_src, final_feats_dim):
    n = features.shape[0]
    n_pad = _round_up(n, TILE_ROWS)
    gnn_dim = params["bottle_w"].shape[1]

    # compose proj_score(proj_gnn(x)) into one [G, G+1] matmul (exact: both linear)
    proj_w = jnp.concatenate(
        [params["proj_gnn_w"],
         params["proj_gnn_w"] @ params["proj_score_w"]], axis=1)
    proj_b = jnp.concatenate(
        [params["proj_gnn_b"],
         params["proj_gnn_b"] @ params["proj_score_w"] + params["proj_score_b"]],
        axis=1)

    # ---- fused encoder chain (one row-tiled pallas_call) --------------------
    # TODO(synk): real KPConv encoder blocks need neighbor indices / kernel
    # points (block_decider code not provided); single unary block used instead.
    packed_pad, feats_norm_pad = _encoder_mlp(
        features, params["enc_w"], params["enc_b"],
        params["bottle_w"], params["bottle_b"], proj_w, proj_b, gnn_dim)
    feats_norm = feats_norm_pad[:n]
    scores_c = packed_pad[:n, gnn_dim:gnn_dim + 1]

    # ---- cross-saliency (flash-style tiled online softmax) ------------------
    temperature = jnp.exp(params["epsilon"]) + 0.03
    src_f, tgt_f = feats_norm[:len_src], feats_norm[len_src:]
    src_s, tgt_s = scores_c[:len_src], scores_c[len_src:]
    s1 = flash_cross_scores(src_f, tgt_f, tgt_s, temperature)   # [Ns, 1]
    s2 = flash_cross_scores(tgt_f, src_f, src_s, temperature)   # [Nt, 1]
    scores_saliency = jnp.concatenate([s1, s2], axis=0)         # [N, 1]
    scores_saliency_pad = _pad_rows(scores_saliency, n_pad)

    # ---- fused decoder chain (one row-tiled pallas_call) --------------------
    # TODO(synk): nearest_upsample / skip concats need multi-resolution neighbor
    # indices (not provided); decoder is unary + last_unary at a single level.
    feats_f, scores2 = _decoder_mlp(
        packed_pad, scores_saliency_pad,
        params["dec1_w"], params["dec1_b"], params["dec2_w"], params["dec2_b"],
        final_feats_dim)
    feats_f = feats_f[:n]
    scores2 = scores2[:n]
    return feats_f, scores2[:, 0], scores2[:, 1]


# ----------------------------------------------------------------------------
# Deterministic parameter init + example run
# ----------------------------------------------------------------------------
def init_params(key, in_feats, enc_dim, gnn_dim, final_dim):
    ks = jax.random.split(key, 12)

    def w(k, shape):
        return (0.1 * jax.random.normal(k, shape)).astype(jnp.float32)

    dec_in = gnn_dim + 2  # condition + add_cross_overlap
    return {
        "epsilon": jnp.asarray(-5.0, jnp.float32),
        "enc_w": w(ks[0], (in_feats, enc_dim)),
        "enc_b": w(ks[1], (1, enc_dim)),
        "bottle_w": w(ks[2], (enc_dim, gnn_dim)),
        "bottle_b": w(ks[3], (1, gnn_dim)),
        "proj_gnn_w": w(ks[4], (gnn_dim, gnn_dim)),
        "proj_gnn_b": w(ks[5], (1, gnn_dim)),
        "proj_score_w": w(ks[6], (gnn_dim, 1)),
        "proj_score_b": w(ks[7], (1, 1)),
        "dec1_w": w(ks[8], (dec_in, enc_dim)),
        "dec1_b": w(ks[9], (1, enc_dim)),
        "dec2_w": w(ks[10], (enc_dim, final_dim + 2)),
        "dec2_b": w(ks[11], (1, final_dim + 2)),
    }


if __name__ == "__main__":
    IN_FEATS = 4      # config.in_feats_dim
    ENC_DIM = 32      # config.first_feats_dim
    GNN_DIM = 32      # config.gnn_feats_dim
    FINAL_DIM = 16    # config.final_feats_dim
    N_SRC, N_TGT = 12, 10
    N = N_SRC + N_TGT

    key = jax.random.PRNGKey(0)
    k_param, k_feat = jax.random.split(key)
    params = init_params(k_param, IN_FEATS, ENC_DIM, GNN_DIM, FINAL_DIM)

    # batch['features'] stacked over src+tgt points, channels-last [N, C]
    features = jax.random.normal(k_feat, (N, IN_FEATS), dtype=jnp.float32)

    feats_f, scores_overlap, scores_saliency = kpfcnn_forward(
        params, features, N_SRC, FINAL_DIM)

    jax.block_until_ready((feats_f, scores_overlap, scores_saliency))
    assert feats_f.shape == (N, FINAL_DIM)
    assert scores_overlap.shape == (N,)
    assert scores_saliency.shape == (N,)
    assert bool(jnp.all(jnp.isfinite(feats_f)))
    assert bool(jnp.all(jnp.isfinite(scores_overlap)))
    assert bool(jnp.all(jnp.isfinite(scores_saliency)))
    print("KERNEL_OK")
</pallas_src>

<mosaic_0001>
module attributes {stable_mosaic.version = 11 : i64} {
  func.func @_encoder_mlp_kernel(%arg0: i32, %arg1: memref<128x4xf32, #tpu.memory_space<vmem>>, %arg2: memref<4x32xf32, #tpu.memory_space<vmem>>, %arg3: memref<1x32xf32, #tpu.memory_space<vmem>>, %arg4: memref<32x32xf32, #tpu.memory_space<vmem>>, %arg5: memref<1x32xf32, #tpu.memory_space<vmem>>, %arg6: memref<32x33xf32, #tpu.memory_space<vmem>>, %arg7: memref<1x33xf32, #tpu.memory_space<vmem>>, %arg8: memref<128x33xf32, #tpu.memory_space<vmem>>, %arg9: memref<128x32xbf16, #tpu.memory_space<vmem>>) attributes {dimension_semantics = [#tpu.dimension_semantics<parallel>], iteration_bounds = array<i64: 1>, scalar_prefetch = 0 : i64, scratch_operands = 0 : i64, tpu.core_type = #tpu.core_type<tc>, window_params = [{transform_indices = @transform_0, window_bounds = array<i64: 128, 4>}, {pipeline_mode = #tpu.pipeline_mode<synchronous>, transform_indices = @transform_1, window_bounds = array<i64: 4, 32>}, {pipeline_mode = #tpu.pipeline_mode<synchronous>, transform_indices = @transform_2, window_bounds = array<i64: 1, 32>}, {pipeline_mode = #tpu.pipeline_mode<synchronous>, transform_indices = @transform_3, window_bounds = array<i64: 32, 32>}, {pipeline_mode = #tpu.pipeline_mode<synchronous>, transform_indices = @transform_4, window_bounds = array<i64: 1, 32>}, {pipeline_mode = #tpu.pipeline_mode<synchronous>, transform_indices = @transform_5, window_bounds = array<i64: 32, 33>}, {pipeline_mode = #tpu.pipeline_mode<synchronous>, transform_indices = @transform_6, window_bounds = array<i64: 1, 33>}, {transform_indices = @transform_7, window_bounds = array<i64: 128, 33>}, {transform_indices = @transform_8, window_bounds = array<i64: 128, 32>}]} {
    %c0 = arith.constant 0 : index
    %c0_0 = arith.constant 0 : index
    %0 = vector.load %arg1[%c0, %c0_0] : memref<128x4xf32, #tpu.memory_space<vmem>>, vector<128x4xf32>
    %c0_1 = arith.constant 0 : index
    %c0_2 = arith.constant 0 : index
    %1 = vector.load %arg2[%c0_1, %c0_2] : memref<4x32xf32, #tpu.memory_space<vmem>>, vector<4x32xf32>
    %cst = arith.constant dense<0.000000e+00> : vector<128x32xf32>
    %2 = tpu.matmul %0, %1, %cst {dimension_numbers = #tpu.dot_dimension_numbers<[1], [0], [0], [1], [0, 0, 1, 1], [], []>} : vector<128x4xf32>, vector<4x32xf32>, vector<128x32xf32> -> vector<128x32xf32>
    %c0_3 = arith.constant 0 : index
    %c0_4 = arith.constant 0 : index
    %3 = vector.load %arg3[%c0_3, %c0_4] : memref<1x32xf32, #tpu.memory_space<vmem>>, vector<1x32xf32>
    %4 = vector.broadcast %3 : vector<1x32xf32> to vector<128x32xf32>
    %5 = arith.addf %2, %4 : vector<128x32xf32>
    %cst_5 = arith.constant 0.000000e+00 : f32
    %6 = vector.broadcast %cst_5 : f32 to vector<128x32xf32>
    %7 = arith.cmpf oge, %5, %6 : vector<128x32xf32>
    %cst_6 = arith.constant 1.000000e-01 : f32
    %8 = vector.broadcast %cst_6 : f32 to vector<128x32xf32>
    %9 = arith.mulf %8, %5 : vector<128x32xf32>
    %10 = arith.select %7, %5, %9 : vector<128x32xi1>, vector<128x32xf32>
    %c0_7 = arith.constant 0 : index
    %c0_8 = arith.constant 0 : index
    %11 = vector.load %arg4[%c0_7, %c0_8] : memref<32x32xf32, #tpu.memory_space<vmem>>, vector<32x32xf32>
    %cst_9 = arith.constant dense<0.000000e+00> : vector<128x32xf32>
    %12 = tpu.matmul %10, %11, %cst_9 {dimension_numbers = #tpu.dot_dimension_numbers<[1], [0], [0], [1], [0, 0, 1, 1], [], []>} : vector<128x32xf32>, vector<32x32xf32>, vector<128x32xf32> -> vector<128x32xf32>
    %c0_10 = arith.constant 0 : index
    %c0_11 = arith.constant 0 : index
    %13 = vector.load %arg5[%c0_10, %c0_11] : memref<1x32xf32, #tpu.memory_space<vmem>>, vector<1x32xf32>
    %14 = vector.broadcast %13 : vector<1x32xf32> to vector<128x32xf32>
    %15 = arith.addf %12, %14 : vector<128x32xf32>
    %c0_12 = arith.constant 0 : index
    %c0_13 = arith.constant 0 : index
    %16 = vector.load %arg6[%c0_12, %c0_13] : memref<32x33xf32, #tpu.memory_space<vmem>>, vector<32x33xf32>
    %cst_14 = arith.constant dense<0.000000e+00> : vector<128x33xf32>
    %17 = tpu.matmul %15, %16, %cst_14 {dimension_numbers = #tpu.dot_dimension_numbers<[1], [0], [0], [1], [0, 0, 1, 1], [], []>} : vector<128x32xf32>, vector<32x33xf32>, vector<128x33xf32> -> vector<128x33xf32>
    %c0_15 = arith.constant 0 : index
    %c0_16 = arith.constant 0 : index
    %18 = vector.load %arg7[%c0_15, %c0_16] : memref<1x33xf32, #tpu.memory_space<vmem>>, vector<1x33xf32>
    %19 = vector.broadcast %18 : vector<1x33xf32> to vector<128x33xf32>
    %20 = arith.addf %17, %19 : vector<128x33xf32>
    %c0_17 = arith.constant 0 : index
    %c0_18 = arith.constant 0 : index
    %21 = vector.load %arg8[%c0_17, %c0_18] : memref<128x33xf32, #tpu.memory_space<vmem>>, vector<128x33xf32>
    tpu.vector_store %arg8[%c0_17, %c0_18], %20 {strides = array<i32>} : memref<128x33xf32, #tpu.memory_space<vmem>>, vector<128x33xf32>,
    %22 = vector.extract_strided_slice %20 {offsets = [0, 0], sizes = [128, 32], strides = [1, 1]} : vector<128x33xf32> to vector<128x32xf32>
    %23 = arith.mulf %22, %22 : vector<128x32xf32>
    %cst_19 = arith.constant dense<0.000000e+00> : vector<128xf32>
    %24 = vector.multi_reduction <add>, %23, %cst_19 [1] : vector<128x32xf32> to vector<128xf32>
    %25 = vector.shape_cast %24 : vector<128xf32> to vector<128x1xf32>
    %cst_20 = arith.constant 1.000000e-24 : f32
    %26 = vector.broadcast %cst_20 : f32 to vector<128x1xf32>
    %27 = arith.maximumf %25, %26 : vector<128x1xf32>
    %28 = math.rsqrt %27 : vector<128x1xf32>
    %29 = vector.broadcast %28 : vector<128x1xf32> to vector<128x32xf32>
    %30 = arith.mulf %22, %29 : vector<128x32xf32>
    %31 = arith.truncf %30 : vector<128x32xf32> to vector<128x32xbf16>
    %c0_21 = arith.constant 0 : index
    %c0_22 = arith.constant 0 : index
    %32 = vector.load %arg9[%c0_21, %c0_22] : memref<128x32xbf16, #tpu.memory_space<vmem>>, vector<128x32xbf16>
    tpu.vector_store %arg9[%c0_21, %c0_22], %31 {strides = array<i32>} : memref<128x32xbf16, #tpu.memory_space<vmem>>, vector<128x32xbf16>,
    return
  }
  func.func @transform_0(%arg0: i32) -> (i32, i32) {
    %c0_i32 = arith.constant 0 : i32
    %c0_i32_0 = arith.constant 0 : i32
    return %arg0, %c0_i32 : i32, i32
  }
  func.func @transform_1(%arg0: i32) -> (i32, i32) {
    %c0_i32 = arith.constant 0 : i32
    %c0_i32_0 = arith.constant 0 : i32
    %c0_i32_1 = arith.constant 0 : i32
    return %c0_i32, %c0_i32_0 : i32, i32
  }
  func.func @transform_2(%arg0: i32) -> (i32, i32) {
    %c0_i32 = arith.constant 0 : i32
    %c0_i32_0 = arith.constant 0 : i32
    %c0_i32_1 = arith.constant 0 : i32
    return %c0_i32, %c0_i32_0 : i32, i32
  }
  func.func @transform_3(%arg0: i32) -> (i32, i32) {
    %c0_i32 = arith.constant 0 : i32
    %c0_i32_0 = arith.constant 0 : i32
    %c0_i32_1 = arith.constant 0 : i32
    return %c0_i32, %c0_i32_0 : i32, i32
  }
  func.func @transform_4(%arg0: i32) -> (i32, i32) {
    %c0_i32 = arith.constant 0 : i32
    %c0_i32_0 = arith.constant 0 : i32
    %c0_i32_1 = arith.constant 0 : i32
    return %c0_i32, %c0_i32_0 : i32, i32
  }
  func.func @transform_5(%arg0: i32) -> (i32, i32) {
    %c0_i32 = arith.constant 0 : i32
    %c0_i32_0 = arith.constant 0 : i32
    %c0_i32_1 = arith.constant 0 : i32
    return %c0_i32, %c0_i32_0 : i32, i32
  }
  func.func @transform_6(%arg0: i32) -> (i32, i32) {
    %c0_i32 = arith.constant 0 : i32
    %c0_i32_0 = arith.constant 0 : i32
    %c0_i32_1 = arith.constant 0 : i32
    return %c0_i32, %c0_i32_0 : i32, i32
  }
  func.func @transform_7(%arg0: i32) -> (i32, i32) {
    %c0_i32 = arith.constant 0 : i32
    %c0_i32_0 = arith.constant 0 : i32
    return %arg0, %c0_i32 : i32, i32
  }
  func.func @transform_8(%arg0: i32) -> (i32, i32) {
    %c0_i32 = arith.constant 0 : i32
    %c0_i32_0 = arith.constant 0 : i32
    return %arg0, %c0_i32 : i32, i32
  }
}

</mosaic_0001>

<bundles_post_ra>
// kernel: tpu_custom_call.1
= control target key start
LH: loop header
LB: loop body
LE: loop exit
PB: predicated region body
PF: predicated region fallthrough
CT: control target
= control target key end

     0   :  { %vm98_vm0 = vcmask 1043456   ;;  %vm49_vm1 = vcmask 31744   ;;  %vm223_vm3 = vcmask 261120   ;;  %s1318_s1 = inlined_call_operand.vmem [shape: f32[4,32], index: 1, kind: input, shape index: {}]   ;;  %s1319_s0 = inlined_call_operand.vmem [shape: f32[128,4], index: 0, kind: input, shape index: {}]   ;;  %s1320_s2 = inlined_call_operand.vmem [shape: f32[1,32], index: 2, kind: input, shape index: {}]   ;;  %s1321_s3 = inlined_call_operand.vmem [shape: f32[32,32], index: 3, kind: input, shape index: {}]   ;;  %s1322_s4 = inlined_call_operand.vmem [shape: f32[1,32], index: 4, kind: input, shape index: {}]   ;;  %s1323_s5 = inlined_call_operand.vmem [shape: f32[32,33], index: 5, kind: input, shape index: {}]   ;;  %s1324_s6 = inlined_call_operand.vmem [shape: f32[1,33], index: 6, kind: input, shape index: {}]   ;;  %s1325_s7 = inlined_call_operand.vmem [shape: f32[128,33], index: 7, kind: output, shape index: {0}]   ;;  %s1326_s8 = inlined_call_operand.vmem [shape: bf16[128,32], index: 8, kind: output, shape index: {1}]  }
   0x1   :  { %v44_v0 = vld [vmem:[%s1318_s1] sm:$0xf]  ;;  %v29_v2 = vld [vmem:[%s1319_s0 + $0x8] sm:$0xff]  ;;  %v30_v3 = vld [vmem:[%s1319_s0 + $0x10] sm:$0xff] }
   0x2   :  { %v28_v1 = vld [vmem:[%s1319_s0] sm:$0xff]  ;;  %772 = vmatpush.msk.msra.mxu0 %vm98_vm0, %v44_v0  ;;  %821 = vmatpush.msk.msra.mxu3 %vm98_vm0, %v44_v0  ;;  %v31_v4 = vld [vmem:[%s1319_s0 + $0x18] sm:$0xff]  ;;  %v33_v6 = vld [vmem:[%s1319_s0 + $0x28] sm:$0xff] }
   0x3   :  { %773 = vmatmul.msk.f32.vlgmr.msra.gmra.mxu0 %vm49_vm1, %v28_v1  ;;  %v32_v5 = vld [vmem:[%s1319_s0 + $0x20] sm:$0xff]  ;;  %v34_v7 = vld [vmem:[%s1319_s0 + $0x30] sm:$0xff]  ;;  %v35_v8 = vld [vmem:[%s1319_s0 + $0x38] sm:$0xff] }
   0x4   :  { %v36_v9 = vld [vmem:[%s1319_s0 + $0x40] sm:$0xff]  ;;  %v41_v10 = vld [vmem:[%s1319_s0 + $0x68] sm:$0xff]  ;;  %v218_v11 = vld [vmem:[%s1321_s3 + $0x18] sm:$0xff] }
   0x5   :  { %786 = vmatmul.msk.f32.vlgmr.msra.gmra.mxu3 %vm49_vm1, %v41_v10  ;;  %284 = vmatpush.msra.mxu1 %v218_v11  ;;  %v37_v12 = vld [vmem:[%s1319_s0 + $0x48] sm:$0xff]  ;;  %v42_v13 = vld [vmem:[%s1319_s0 + $0x70] sm:$0xff]  ;;  %v43_v15 = vld [vmem:[%s1319_s0 + $0x78] sm:$0xff] }
   0x6   :  { %822 = vmatpush.msrb.mxu3 %v218_v11  ;;  %v38_v14 = vld [vmem:[%s1319_s0 + $0x50] sm:$0xff]  ;;  %v39_v16 = vld [vmem:[%s1319_s0 + $0x58] sm:$0xff]  ;;  %v40_v17 = vld [vmem:[%s1319_s0 + $0x60] sm:$0xff] }
   0x7   :  { %v217_v18 = vld [vmem:[%s1321_s3 + $0x10] sm:$0xff]  ;;  %v216_v19 = vld [vmem:[%s1321_s3 + $0x8] sm:$0xff]  ;;  %v215_v20 = vld [vmem:[%s1321_s3] sm:$0xff] }
   0x8   :  { %285 = vmatpush.msra.mxu1 %v217_v18  ;;  %823 = vmatpush.msrb.mxu3 %v217_v18  ;;  %v992_v21 = vld [vmem:[%s1320_s2] ss:$0 sm:$0xff]  ;;  %v338_v11 = vld [vmem:[%s1323_s5 + $0x8] sm:$0xff] }
   0xa   :  { %286 = vmatpush.msra.mxu1 %v216_v19  ;;  %824 = vmatpush.msrb.mxu3 %v216_v19 }
   0xb   :  { %774 = vmatmul.msk.f32.gmra.mxu0 %vm49_vm1, %v29_v2 }
   0xc   :  { %287 = vmatpush.msra.mxu1 %v215_v20  ;;  %825 = vmatpush.msrb.mxu3 %v215_v20 }
   0xd   :  { %787 = vmatmul.msk.f32.gmra.mxu3 %vm49_vm1, %v42_v13  ;;  %v337_v13 = vld [vmem:[%s1323_s5] sm:$0xff] }
  0x13   :  { %775 = vmatmul.msk.f32.gmra.mxu0 %vm49_vm1, %v30_v3 }
  0x15   :  { %788 = vmatmul.msk.f32.gmra.mxu3 %vm49_vm1, %v43_v15 }
  0x1b   :  { %776 = vmatmul.msk.f32.gmra.mxu0 %vm49_vm1, %v31_v4 }
  0x23   :  { %777 = vmatmul.msk.f32.gmra.mxu0 %vm49_vm1, %v32_v5 }
  0x2b   :  { %778 = vmatmul.msk.f32.gmra.mxu0 %vm49_vm1, %v33_v6 }
  0x33   :  { %779 = vmatmul.msk.f32.gmra.mxu0 %vm49_vm1, %v34_v7  ;;  %v340_v7 = vld [vmem:[%s1323_s5 + $0x18] sm:$0xff] }
  0x34   :  { %405 = vmatpush.msra.mxu2 %v340_v7  ;;  %826 = vmatpush.msra.mxu3 %v340_v7 }
  0x3b   :  { %780 = vmatmul.msk.f32.gmra.mxu0 %vm49_vm1, %v35_v8  ;;  %v339_v8 = vld [vmem:[%s1323_s5 + $0x10] sm:$0xff] }
  0x3c   :  { %406 = vmatpush.msra.mxu2 %v339_v8  ;;  %827 = vmatpush.msra.mxu3 %v339_v8 }
  0x3e   :  { %407 = vmatpush.msra.mxu2 %v338_v11  ;;  %828 = vmatpush.msra.mxu3 %v338_v11 }
  0x40   :  { %408 = vmatpush.msra.mxu2 %v337_v13  ;;  %829 = vmatpush.msra.mxu3 %v337_v13 }
  0x43   :  { %781 = vmatmul.msk.f32.gmra.mxu0 %vm49_vm1, %v36_v9 }
  0x4b   :  { %782 = vmatmul.msk.f32.gmra.mxu0 %vm49_vm1, %v37_v12 }
  0x53   :  { %783 = vmatmul.msk.f32.gmra.mxu0 %vm49_vm1, %v38_v14 }
  0x5b   :  { %784 = vmatmul.msk.f32.gmra.mxu0 %vm49_vm1, %v39_v16 }
  0x63   :  { %785 = vmatmul.msk.f32.gmra.mxu0 %vm49_vm1, %v40_v17 }
  0x80   :  { %v119_v22 = vpop.f32.mrf.mxu0 }
  0x81   :  { %v120_v23 = vadd.f32 %v992_v21, %v119_v22 }
  0x83   :  { %v183_v24 = vmul.f32 0.1, %v120_v23  ;;  %vm167_vm2 = vcmp.ge.f32.partialorder %v120_v23, 0.0 }
  0x85   :  { %v199_v25 = vsel %vm167_vm2, %v120_v23, %v183_v24 }
  0x86   :  { %789 = vmatmul.msk.f32.vlgmr.msra.gmra.mxu1 %vm223_vm3, %v199_v25 }
  0x88   :  { %v122_v26 = vpop.f32.mrf.mxu0  ;;  %v158_v6 = vpop.f32.mrf.mxu3 }
  0x89   :  { %v123_v27 = vadd.f32 %v992_v21, %v122_v26  ;;  %v159_v14 = vadd.f32 %v992_v21, %v158_v6 }
  0x8b   :  { %v184_v28 = vmul.f32 0.1, %v123_v27  ;;  %vm168_vm4 = vcmp.ge.f32.partialorder %v123_v27, 0.0  ;;  %v196_v17 = vmul.f32 0.1, %v159_v14  ;;  %vm180_vm0 = vcmp.ge.f32.partialorder %v159_v14, 0.0 }
  0x8d   :  { %v200_v29 = vsel %vm168_vm4, %v123_v27, %v184_v28  ;;  %v212_v19 = vsel %vm180_vm0, %v159_v14, %v196_v17  ;;  %v831_v27 = vld [vmem:[%s1322_s4] ss:$0 sm:$0xff]  ;;  %vm458_vm4 = vcmask 269312  }
  0x8e   :  { %790 = vmatmul.msk.f32.gmra.mxu1 %vm223_vm3, %v200_v29 }
  0x90   :  { %v125_v30 = vpop.f32.mrf.mxu0  ;;  %v161_v16 = vpop.f32.mrf.mxu3 }
  0x91   :  { %v126_v31 = vadd.f32 %v992_v21, %v125_v30  ;;  %v162_v18 = vadd.f32 %v992_v21, %v161_v16 }
  0x93   :  { %v185_v32 = vmul.f32 0.1, %v126_v31  ;;  %vm169_vm5 = vcmp.ge.f32.partialorder %v126_v31, 0.0  ;;  %v197_v20 = vmul.f32 0.1, %v162_v18  ;;  %vm181_vm1 = vcmp.ge.f32.partialorder %v162_v18, 0.0 }
  0x95   :  { %v201_v33 = vsel %vm169_vm5, %v126_v31, %v185_v32  ;;  %v213_v24 = vsel %vm181_vm1, %v162_v18, %v197_v20 }
  0x96   :  { %791 = vmatmul.msk.f32.gmra.mxu1 %vm223_vm3, %v201_v33 }
  0x98   :  { %v128_v34 = vpop.f32.mrf.mxu0  ;;  %v164_v22 = vpop.f32.mrf.mxu3 }
  0x99   :  { %v129_v35 = vadd.f32 %v992_v21, %v128_v34  ;;  %v165_v23 = vadd.f32 %v992_v21, %v164_v22 }
  0x9b   :  { %v186_v36 = vmul.f32 0.1, %v129_v35  ;;  %vm170_vm6 = vcmp.ge.f32.partialorder %v129_v35, 0.0  ;;  %v198_v25 = vmul.f32 0.1, %v165_v23  ;;  %vm182_vm2 = vcmp.ge.f32.partialorder %v165_v23, 0.0 }
  0x9d   :  { %v202_v37 = vsel %vm170_vm6, %v129_v35, %v186_v36  ;;  %v214_v26 = vsel %vm182_vm2, %v165_v23, %v198_v25 }
  0x9e   :  { %792 = vmatmul.msk.f32.gmra.mxu1 %vm223_vm3, %v202_v37 }
  0xa0   :  { %v131_v38 = vpop.f32.mrf.mxu0 }
  0xa1   :  { %v132_v39 = vadd.f32 %v992_v21, %v131_v38 }
  0xa3   :  { %v187_v40 = vmul.f32 0.1, %v132_v39  ;;  %vm171_vm7 = vcmp.ge.f32.partialorder %v132_v39, 0.0 }
  0xa5   :  { %v203_v41 = vsel %vm171_vm7, %v132_v39, %v187_v40 }
  0xa6   :  { %793 = vmatmul.msk.f32.gmra.mxu1 %vm223_vm3, %v203_v41 }
  0xa8   :  { %v134_v42 = vpop.f32.mrf.mxu0 }
  0xa9   :  { %v135_v43 = vadd.f32 %v992_v21, %v134_v42 }
  0xab   :  { %v188_v44 = vmul.f32 0.1, %v135_v43  ;;  %vm172_vm8 = vcmp.ge.f32.partialorder %v135_v43, 0.0 }
  0xad   :  { %v204_v45 = vsel %vm172_vm8, %v135_v43, %v188_v44  ;;  %vm747_vm8 = vcmask 257024  }
  0xae   :  { %794 = vmatmul.msk.f32.gmra.mxu1 %vm223_vm3, %v204_v45 }
  0xb0   :  { %v137_v46 = vpop.f32.mrf.mxu0 }
  0xb1   :  { %v138_v47 = vadd.f32 %v992_v21, %v137_v46 }
  0xb3   :  { %v189_v48 = vmul.f32 0.1, %v138_v47  ;;  %vm173_vm9 = vcmp.ge.f32.partialorder %v138_v47, 0.0 }
  0xb5   :  { %v205_v49 = vsel %vm173_vm9, %v138_v47, %v189_v48 }
  0xb6   :  { %795 = vmatmul.msk.f32.gmra.mxu1 %vm223_vm3, %v205_v49 }
  0xb8   :  { %v140_v50 = vpop.f32.mrf.mxu0 }
  0xb9   :  { %v141_v51 = vadd.f32 %v992_v21, %v140_v50 }
  0xbb   :  { %v190_v52 = vmul.f32 0.1, %v141_v51  ;;  %vm174_vm10 = vcmp.ge.f32.partialorder %v141_v51, 0.0 }
  0xbd   :  { %v206_v53 = vsel %vm174_vm10, %v141_v51, %v190_v52 }
  0xbe   :  { %796 = vmatmul.msk.f32.gmra.mxu1 %vm223_vm3, %v206_v53 }
  0xc0   :  { %v143_v54 = vpop.f32.mrf.mxu0 }
  0xc1   :  { %v144_v55 = vadd.f32 %v992_v21, %v143_v54 }
  0xc3   :  { %v191_v56 = vmul.f32 0.1, %v144_v55  ;;  %vm175_vm11 = vcmp.ge.f32.partialorder %v144_v55, 0.0 }
  0xc5   :  { %v207_v57 = vsel %vm175_vm11, %v144_v55, %v191_v56 }
  0xc6   :  { %797 = vmatmul.msk.f32.gmra.mxu1 %vm223_vm3, %v207_v57 }
  0xc8   :  { %v146_v58 = vpop.f32.mrf.mxu0 }
  0xc9   :  { %v147_v59 = vadd.f32 %v992_v21, %v146_v58 }
  0xcb   :  { %v192_v60 = vmul.f32 0.1, %v147_v59  ;;  %vm176_vm12 = vcmp.ge.f32.partialorder %v147_v59, 0.0 }
  0xcd   :  { %v208_v61 = vsel %vm176_vm12, %v147_v59, %v192_v60  ;;  %v1060_v59 = vld [vmem:[%s1324_s6] ss:$0 sm:$0xff] }
  0xce   :  { %798 = vmatmul.msk.f32.gmra.mxu1 %vm223_vm3, %v208_v61 }
  0xd0   :  { %v149_v62 = vpop.f32.mrf.mxu0 }
  0xd1   :  { %v150_v63 = vadd.f32 %v992_v21, %v149_v62 }
  0xd3   :  { %v193_v0 = vmul.f32 0.1, %v150_v63  ;;  %vm177_vm13 = vcmp.ge.f32.partialorder %v150_v63, 0.0 }
  0xd5   :  { %v209_v1 = vsel %vm177_vm13, %v150_v63, %v193_v0 }
  0xd6   :  { %799 = vmatmul.msk.f32.gmra.mxu1 %vm223_vm3, %v209_v1 }
  0xd8   :  { %v152_v2 = vpop.f32.mrf.mxu0 }
  0xd9   :  { %v153_v3 = vadd.f32 %v992_v21, %v152_v2 }
  0xdb   :  { %v194_v4 = vmul.f32 0.1, %v153_v3  ;;  %vm178_vm14 = vcmp.ge.f32.partialorder %v153_v3, 0.0 }
  0xdd   :  { %v210_v5 = vsel %vm178_vm14, %v153_v3, %v194_v4 }
  0xde   :  { %800 = vmatmul.msk.f32.gmra.mxu1 %vm223_vm3, %v210_v5 }
  0xe0   :  { %v155_v9 = vpop.f32.mrf.mxu0 }
  0xe1   :  { %v156_v10 = vadd.f32 %v992_v21, %v155_v9 }
  0xe3   :  { %vm179_vm15 = vcmp.ge.f32.partialorder %v156_v10, 0.0  ;;  %v195_v12 = vmul.f32 0.1, %v156_v10 }
  0xe5   :  { %v211_v15 = vsel %vm179_vm15, %v156_v10, %v195_v12 }
  0xe6   :  { %801 = vmatmul.msk.f32.vlgmr.msrb.gmra.mxu3 %vm223_vm3, %v211_v15 }
  0xee   :  { %802 = vmatmul.msk.f32.gmra.mxu3 %vm223_vm3, %v212_v19 }
  0xf6   :  { %803 = vmatmul.msk.f32.gmra.mxu3 %vm223_vm3, %v213_v24 }
  0xfe   :  { %804 = vmatmul.msk.f32.gmra.mxu3 %vm223_vm3, %v214_v26 }
 0x103   :  { %v289_v28 = vpop.f32.mrf.mxu1 }
 0x104   :  { %v290_v29 = vadd.f32 %v831_v27, %v289_v28 }
 0x106   :  { %805 = vmatmul.msk.f32.vlgmr.msra.gmra.mxu2 %vm223_vm3, %v290_v29 }
 0x10b   :  { %v292_v30 = vpop.f32.mrf.mxu1 }
 0x10c   :  { %v293_v31 = vadd.f32 %v831_v27, %v292_v30 }
 0x10e   :  { %806 = vmatmul.msk.f32.gmra.mxu2 %vm223_vm3, %v293_v31 }
 0x113   :  { %v295_v21 = vpop.f32.mrf.mxu1 }
 0x114   :  { %v296_v32 = vadd.f32 %v831_v27, %v295_v21 }
 0x116   :  { %807 = vmatmul.msk.f32.gmra.mxu2 %vm223_vm3, %v296_v32 }
 0x11b   :  { %v298_v33 = vpop.f32.mrf.mxu1 }
 0x11c   :  { %v299_v34 = vadd.f32 %v831_v27, %v298_v33 }
 0x11e   :  { %808 = vmatmul.msk.f32.gmra.mxu2 %vm223_vm3, %v299_v34 }
 0x123   :  { %v301_v35 = vpop.f32.mrf.mxu1 }
 0x124   :  { %v302_v36 = vadd.f32 %v831_v27, %v301_v35 }
 0x126   :  { %809 = vmatmul.msk.f32.gmra.mxu2 %vm223_vm3, %v302_v36 }
 0x12b   :  { %v304_v37 = vpop.f32.mrf.mxu1 }
 0x12c   :  { %v305_v38 = vadd.f32 %v831_v27, %v304_v37 }
 0x12e   :  { %810 = vmatmul.msk.f32.gmra.mxu2 %vm223_vm3, %v305_v38 }
 0x133   :  { %v307_v39 = vpop.f32.mrf.mxu1 }
 0x134   :  { %v308_v40 = vadd.f32 %v831_v27, %v307_v39 }
 0x136   :  { %811 = vmatmul.msk.f32.gmra.mxu2 %vm223_vm3, %v308_v40 }
 0x13b   :  { %v310_v41 = vpop.f32.mrf.mxu1 }
 0x13c   :  { %v311_v42 = vadd.f32 %v831_v27, %v310_v41 }
 0x13e   :  { %812 = vmatmul.msk.f32.gmra.mxu2 %vm223_vm3, %v311_v42 }
 0x143   :  { %v313_v43 = vpop.f32.mrf.mxu1 }
 0x144   :  { %v314_v44 = vadd.f32 %v831_v27, %v313_v43 }
 0x146   :  { %813 = vmatmul.msk.f32.gmra.mxu2 %vm223_vm3, %v314_v44 }
 0x14b   :  { %v316_v45 = vpop.f32.mrf.mxu1 }
 0x14c   :  { %v317_v46 = vadd.f32 %v831_v27, %v316_v45 }
 0x14e   :  { %814 = vmatmul.msk.f32.gmra.mxu2 %vm223_vm3, %v317_v46 }
 0x153   :  { %v319_v47 = vpop.f32.mrf.mxu1 }
 0x154   :  { %v320_v48 = vadd.f32 %v831_v27, %v319_v47 }
 0x156   :  { %815 = vmatmul.msk.f32.gmra.mxu2 %vm223_vm3, %v320_v48 }
 0x15b   :  { %v322_v49 = vpop.f32.mrf.mxu1 }
 0x15c   :  { %v323_v50 = vadd.f32 %v831_v27, %v322_v49 }
 0x15e   :  { %816 = vmatmul.msk.f32.gmra.mxu2 %vm223_vm3, %v323_v50 }
 0x169   :  { %v325_v51 = vpop.f32.mrf.mxu3 }
 0x16a   :  { %v326_v52 = vadd.f32 %v831_v27, %v325_v51 }
 0x16c   :  { %817 = vmatmul.msk.f32.vlgmr.msra.gmra.mxu3 %vm223_vm3, %v326_v52 }
 0x171   :  { %v328_v53 = vpop.f32.mrf.mxu3 }
 0x172   :  { %v329_v54 = vadd.f32 %v831_v27, %v328_v53 }
 0x174   :  { %818 = vmatmul.msk.f32.gmra.mxu3 %vm223_vm3, %v329_v54 }
 0x179   :  { %v331_v55 = vpop.f32.mrf.mxu3 }
 0x17a   :  { %v332_v56 = vadd.f32 %v831_v27, %v331_v55 }
 0x17c   :  { %819 = vmatmul.msk.f32.gmra.mxu3 %vm223_vm3, %v332_v56 }
 0x181   :  { %v334_v57 = vpop.f32.mrf.mxu3 }
 0x182   :  { %v335_v58 = vadd.f32 %v831_v27, %v334_v57 }
 0x184   :  { %820 = vmatmul.msk.f32.gmra.mxu3 %vm223_vm3, %v335_v58 }
 0x189   :  { %v410_v60 = vpop.f32.mrf.mxu2 }
 0x18a   :  { %v1063_v61 = vadd.f32 %v1060_v59, %v410_v60 }
 0x18c   :  { %459 = vst.msk [vmem:[%s1325_s7] sm:$0xff] %vm458_vm4, %v1063_v61  ;;  %v475_v62 = vmul.f32 %v1063_v61, %v1063_v61 }
 0x18e   :  { %v491_v63 = vsel %vm223_vm3, %v475_v62, 0.0 }
 0x18f   :  { %492 = vadd.xlane.f32.xlu0 %v491_v63 }
 0x191   :  { %v413_v0 = vpop.f32.mrf.mxu2 }
 0x192   :  { %v1074_v1 = vadd.f32 %v1060_v59, %v413_v0 }
 0x194   :  { %460 = vst.msk [vmem:[%s1325_s7 + $0x8] sm:$0xff] %vm458_vm4, %v1074_v1  ;;  %v476_v2 = vmul.f32 %v1074_v1, %v1074_v1 }
 0x196   :  { %v494_v3 = vsel %vm223_vm3, %v476_v2, 0.0 }
 0x197   :  { %495 = vadd.xlane.f32.xlu0 %v494_v3 }
 0x199   :  { %v416_v4 = vpop.f32.mrf.mxu2 }
 0x19a   :  { %v1085_v5 = vadd.f32 %v1060_v59, %v416_v4 }
 0x19c   :  { %461 = vst.msk [vmem:[%s1325_s7 + $0x10] sm:$0xff] %vm458_vm4, %v1085_v5  ;;  %v477_v6 = vmul.f32 %v1085_v5, %v1085_v5 }
 0x19e   :  { %v497_v7 = vsel %vm223_vm3, %v477_v6, 0.0 }
 0x19f   :  { %498 = vadd.xlane.f32.xlu1 %v497_v7 }
 0x1a1   :  { %v419_v8 = vpop.f32.mrf.mxu2 }
 0x1a2   :  { %v1096_v9 = vadd.f32 %v1060_v59, %v419_v8 }
 0x1a4   :  { %462 = vst.msk [vmem:[%s1325_s7 + $0x18] sm:$0xff] %vm458_vm4, %v1096_v9  ;;  %v478_v10 = vmul.f32 %v1096_v9, %v1096_v9 }
 0x1a6   :  { %v500_v11 = vsel %vm223_vm3, %v478_v10, 0.0 }
 0x1a7   :  { %501 = vadd.xlane.f32.xlu1 %v500_v11 }
 0x1a9   :  { %v422_v12 = vpop.f32.mrf.mxu2 }
 0x1aa   :  { %v1107_v13 = vadd.f32 %v1060_v59, %v422_v12 }
 0x1ac   :  { %463 = vst.msk [vmem:[%s1325_s7 + $0x20] sm:$0xff] %vm458_vm4, %v1107_v13  ;;  %v479_v14 = vmul.f32 %v1107_v13, %v1107_v13 }
 0x1ae   :  { %v503_v15 = vsel %vm223_vm3, %v479_v14, 0.0 }
 0x1af   :  { %504 = vadd.xlane.f32.xlu2 %v503_v15 }
 0x1b1   :  { %v425_v16 = vpop.f32.mrf.mxu2 }
 0x1b2   :  { %v1118_v17 = vadd.f32 %v1060_v59, %v425_v16 }
 0x1b4   :  { %464 = vst.msk [vmem:[%s1325_s7 + $0x28] sm:$0xff] %vm458_vm4, %v1118_v17  ;;  %v480_v18 = vmul.f32 %v1118_v17, %v1118_v17 }
 0x1b6   :  { %v506_v19 = vsel %vm223_vm3, %v480_v18, 0.0 }
 0x1b7   :  { %507 = vadd.xlane.f32.xlu2 %v506_v19 }
 0x1b9   :  { %v428_v20 = vpop.f32.mrf.mxu2 }
 0x1ba   :  { %v1129_v22 = vadd.f32 %v1060_v59, %v428_v20 }
 0x1bc   :  { %465 = vst.msk [vmem:[%s1325_s7 + $0x30] sm:$0xff] %vm458_vm4, %v1129_v22  ;;  %v481_v23 = vmul.f32 %v1129_v22, %v1129_v22 }
 0x1be   :  { %v509_v24 = vsel %vm223_vm3, %v481_v23, 0.0 }
 0x1bf   :  { %510 = vadd.xlane.f32.xlu0 %v509_v24 }
 0x1c1   :  { %v431_v25 = vpop.f32.mrf.mxu2 }
 0x1c2   :  { %v1140_v26 = vadd.f32 %v1060_v59, %v431_v25 }
 0x1c4   :  { %466 = vst.msk [vmem:[%s1325_s7 + $0x38] sm:$0xff] %vm458_vm4, %v1140_v26  ;;  %v482_v27 = vmul.f32 %v1140_v26, %v1140_v26 }
 0x1c6   :  { %v512_v28 = vsel %vm223_vm3, %v482_v27, 0.0 }
 0x1c7   :  { %513 = vadd.xlane.f32.xlu1 %v512_v28 }
 0x1c9   :  { %v434_v29 = vpop.f32.mrf.mxu2 }
 0x1ca   :  { %v1151_v30 = vadd.f32 %v1060_v59, %v434_v29 }
 0x1cc   :  { %467 = vst.msk [vmem:[%s1325_s7 + $0x40] sm:$0xff] %vm458_vm4, %v1151_v30  ;;  %v483_v31 = vmul.f32 %v1151_v30, %v1151_v30 }
 0x1ce   :  { %v515_v21 = vsel %vm223_vm3, %v483_v31, 0.0 }
 0x1cf   :  { %516 = vadd.xlane.f32.xlu2 %v515_v21 }
 0x1d1   :  { %v437_v32 = vpop.f32.mrf.mxu2 }
 0x1d2   :  { %v1162_v33 = vadd.f32 %v1060_v59, %v437_v32 }
 0x1d4   :  { %468 = vst.msk [vmem:[%s1325_s7 + $0x48] sm:$0xff] %vm458_vm4, %v1162_v33  ;;  %v484_v34 = vmul.f32 %v1162_v33, %v1162_v33 }
 0x1d6   :  { %v518_v35 = vsel %vm223_vm3, %v484_v34, 0.0 }
 0x1d7   :  { %519 = vadd.xlane.f32.xlu0 %v518_v35 }
 0x1d9   :  { %v440_v36 = vpop.f32.mrf.mxu2 }
 0x1da   :  { %v1173_v37 = vadd.f32 %v1060_v59, %v440_v36 }
 0x1dc   :  { %469 = vst.msk [vmem:[%s1325_s7 + $0x50] sm:$0xff] %vm458_vm4, %v1173_v37  ;;  %v485_v38 = vmul.f32 %v1173_v37, %v1173_v37 }
 0x1de   :  { %v521_v39 = vsel %vm223_vm3, %v485_v38, 0.0 }
 0x1df   :  { %522 = vadd.xlane.f32.xlu1 %v521_v39 }
 0x1e1   :  { %v443_v40 = vpop.f32.mrf.mxu2 }
 0x1e2   :  { %v1184_v41 = vadd.f32 %v1060_v59, %v443_v40 }
 0x1e4   :  { %470 = vst.msk [vmem:[%s1325_s7 + $0x58] sm:$0xff] %vm458_vm4, %v1184_v41  ;;  %v486_v42 = vmul.f32 %v1184_v41, %v1184_v41 }
 0x1e6   :  { %v524_v43 = vsel %vm223_vm3, %v486_v42, 0.0 }
 0x1e7   :  { %525 = vadd.xlane.f32.xlu2 %v524_v43 }
 0x1ef   :  { %v446_v44 = vpop.f32.mrf.mxu3 }
 0x1f0   :  { %v1195_v45 = vadd.f32 %v1060_v59, %v446_v44 }
 0x1f2   :  { %471 = vst.msk [vmem:[%s1325_s7 + $0x60] sm:$0xff] %vm458_vm4, %v1195_v45  ;;  %v487_v46 = vmul.f32 %v1195_v45, %v1195_v45 }
 0x1f4   :  { %v527_v47 = vsel %vm223_vm3, %v487_v46, 0.0 }
 0x1f5   :  { %528 = vadd.xlane.f32.xlu0 %v527_v47 }
 0x1f7   :  { %v449_v48 = vpop.f32.mrf.mxu3 }
 0x1f8   :  { %v1206_v49 = vadd.f32 %v1060_v59, %v449_v48 }
 0x1fa   :  { %472 = vst.msk [vmem:[%s1325_s7 + $0x68] sm:$0xff] %vm458_vm4, %v1206_v49  ;;  %v488_v50 = vmul.f32 %v1206_v49, %v1206_v49 }
 0x1fc   :  { %v530_v51 = vsel %vm223_vm3, %v488_v50, 0.0 }
 0x1fd   :  { %531 = vadd.xlane.f32.xlu1 %v530_v51 }
 0x1ff   :  { %v452_v52 = vpop.f32.mrf.mxu3 }
 0x200   :  { %v1217_v53 = vadd.f32 %v1060_v59, %v452_v52 }
 0x202   :  { %473 = vst.msk [vmem:[%s1325_s7 + $0x70] sm:$0xff] %vm458_vm4, %v1217_v53  ;;  %v493_v54 = vpop.xlane.xlu0 %492  ;;  %v489_v55 = vmul.f32 %v1217_v53, %v1217_v53 }
 0x203   :  { %v539_v56 = vmax.f32 %v493_v54, 1e-24 }
 0x204   :  { %v533_v57 = vsel %vm223_vm3, %v489_v55, 0.0 }
 0x205   :  { %833 = vrsqrt.f32 %v539_v56  ;;  %534 = vadd.xlane.f32.xlu2 %v533_v57  ;;  %vm561_vm6 = vweird.f32 %v539_v56 }
 0x207   :  { %v455_v58 = vpop.f32.mrf.mxu3 }
 0x208   :  { %v1228_v60 = vadd.f32 %v1060_v59, %v455_v58 }
 0x20a   :  { %474 = vst.msk [vmem:[%s1325_s7 + $0x78] sm:$0xff] %vm458_vm4, %v1228_v60  ;;  %v496_v62 = vpop.xlane.xlu0 %495  ;;  %v490_v63 = vmul.f32 %v1228_v60, %v1228_v60 }
 0x20b   :  { %v834_v0 = vpop.eup %833  ;;  %v540_v2 = vmax.f32 %v496_v62, 1e-24 }
 0x20c   :  { %v556_v3 = vmul.f32 %v834_v0, %v539_v56  ;;  %v536_v4 = vsel %vm223_vm3, %v490_v63, 0.0  ;;  %vm562_vm5 = vweird.f32 %v834_v0 }
 0x20d   :  { %835 = vrsqrt.f32 %v540_v2  ;;  %537 = vadd.xlane.f32.xlu0 %v536_v4  ;;  %vm563_vm7 = vmor %vm561_vm6, %vm562_vm5  ;;  %vm571_vm9 = vweird.f32 %v540_v2 }
 0x20e   :  { %v557_v6 = vmul.f32 %v834_v0, %v556_v3 }
 0x210   :  { %v558_v59 = vmul.f32 0.5, %v557_v6 }
 0x212   :  { %v559_v7 = vsub.f32 1.5, %v558_v59  ;;  %v499_v8 = vpop.xlane.xlu1 %498 }
 0x213   :  { %v836_v10 = vpop.eup %835  ;;  %v541_v11 = vmax.f32 %v499_v8, 1e-24 }
 0x214   :  { %v560_v12 = vmul.f32 %v834_v0, %v559_v7  ;;  %v566_v14 = vmul.f32 %v836_v10, %v540_v2  ;;  %vm572_vm3 = vweird.f32 %v836_v10 }
 0x215   :  { %837 = vrsqrt.f32 %v541_v11  ;;  %vm573_vm10 = vmor %vm571_vm9, %vm572_vm3  ;;  %vm581_vm12 = vweird.f32 %v541_v11 }
 0x216   :  { %v564_v15 = vsel %vm563_vm7, %v834_v0, %v560_v12  ;;  %v567_v16 = vmul.f32 %v836_v10, %v566_v14 }
 0x217   :  { %v715_v18 = vmul.f32 %v564_v15, %v1063_v61 }
 0x218   :  { %v568_v19 = vmul.f32 0.5, %v567_v16 }
 0x219   :  { %v731_v20 = vpack.c.bf16 %v715_v18, %v715_v18 }
 0x21a   :  { %v569_v23 = vsub.f32 1.5, %v568_v19  ;;  %v502_v24 = vpop.xlane.xlu1 %501 }
 0x21b   :  { %v838_v25 = vpop.eup %837  ;;  %748 = vst.msk [vmem:[%s1326_s8] sm:$0xf] %vm747_vm8, %v731_v20  ;;  %v542_v27 = vmax.f32 %v502_v24, 1e-24 }
 0x21c   :  { %v570_v28 = vmul.f32 %v836_v10, %v569_v23  ;;  %v576_v29 = vmul.f32 %v838_v25, %v541_v11  ;;  %vm582_vm11 = vweird.f32 %v838_v25 }
 0x21d   :  { %839 = vrsqrt.f32 %v542_v27  ;;  %vm583_vm13 = vmor %vm581_vm12, %vm582_vm11  ;;  %vm591_vm15 = vweird.f32 %v542_v27 }
 0x21e   :  { %v574_v31 = vsel %vm573_vm10, %v836_v10, %v570_v28  ;;  %v577_v61 = vmul.f32 %v838_v25, %v576_v29 }
 0x21f   :  { %v716_v21 = vmul.f32 %v574_v31, %v1074_v1 }
 0x220   :  { %v578_v32 = vmul.f32 0.5, %v577_v61 }
 0x221   :  { %v732_v34 = vpack.c.bf16 %v716_v21, %v716_v21 }
 0x222   :  { %v579_v35 = vsub.f32 1.5, %v578_v32  ;;  %v505_v36 = vpop.xlane.xlu2 %504 }
 0x223   :  { %v840_v38 = vpop.eup %839  ;;  %749 = vst.msk [vmem:[%s1326_s8 + $0x4] sm:$0xf] %vm747_vm8, %v732_v34  ;;  %v543_v39 = vmax.f32 %v505_v36, 1e-24 }
 0x224   :  { %v580_v40 = vmul.f32 %v838_v25, %v579_v35  ;;  %v586_v42 = vmul.f32 %v840_v38, %v542_v27  ;;  %vm592_vm14 = vweird.f32 %v840_v38 }
 0x225   :  { %841 = vrsqrt.f32 %v543_v39  ;;  %vm593_vm0 = vmor %vm591_vm15, %vm592_vm14  ;;  %vm601_vm2 = vweird.f32 %v543_v39 }
 0x226   :  { %v584_v43 = vsel %vm583_vm13, %v838_v25, %v580_v40  ;;  %v587_v44 = vmul.f32 %v840_v38, %v586_v42 }
 0x227   :  { %v717_v1 = vmul.f32 %v584_v43, %v1085_v5 }
 0x228   :  { %v588_v46 = vmul.f32 0.5, %v587_v44 }
 0x229   :  { %v733_v47 = vpack.c.bf16 %v717_v1, %v717_v1 }
 0x22a   :  { %v589_v48 = vsub.f32 1.5, %v588_v46  ;;  %v508_v50 = vpop.xlane.xlu2 %507 }
 0x22b   :  { %v842_v51 = vpop.eup %841  ;;  %750 = vst.msk [vmem:[%s1326_s8 + $0x8] sm:$0xf] %vm747_vm8, %v733_v47  ;;  %v544_v52 = vmax.f32 %v508_v50, 1e-24 }
 0x22c   :  { %v590_v54 = vmul.f32 %v840_v38, %v589_v48  ;;  %v596_v55 = vmul.f32 %v842_v51, %v543_v39  ;;  %vm602_vm1 = vweird.f32 %v842_v51 }
 0x22d   :  { %843 = vrsqrt.f32 %v544_v52  ;;  %vm603_vm4 = vmor %vm601_vm2, %vm602_vm1  ;;  %vm611_vm6 = vweird.f32 %v544_v52 }
 0x22e   :  { %v594_v56 = vsel %vm593_vm0, %v840_v38, %v590_v54  ;;  %v597_v57 = vmul.f32 %v842_v51, %v596_v55 }
 0x22f   :  { %v718_v5 = vmul.f32 %v594_v56, %v1096_v9 }
 0x230   :  { %v598_v58 = vmul.f32 0.5, %v597_v57 }
 0x231   :  { %v734_v62 = vpack.c.bf16 %v718_v5, %v718_v5 }
 0x232   :  { %v599_v63 = vsub.f32 1.5, %v598_v58  ;;  %v511_v0 = vpop.xlane.xlu0 %510 }
 0x233   :  { %v844_v2 = vpop.eup %843  ;;  %751 = vst.msk [vmem:[%s1326_s8 + $0xc] sm:$0xf] %vm747_vm8, %v734_v62  ;;  %v545_v3 = vmax.f32 %v511_v0, 1e-24 }
 0x234   :  { %v600_v4 = vmul.f32 %v842_v51, %v599_v63  ;;  %v606_v6 = vmul.f32 %v844_v2, %v544_v52  ;;  %vm612_vm5 = vweird.f32 %v844_v2 }
 0x235   :  { %845 = vrsqrt.f32 %v545_v3  ;;  %vm613_vm7 = vmor %vm611_vm6, %vm612_vm5  ;;  %vm621_vm9 = vweird.f32 %v545_v3 }
 0x236   :  { %v604_v59 = vsel %vm603_vm4, %v842_v51, %v600_v4  ;;  %v607_v7 = vmul.f32 %v844_v2, %v606_v6 }
 0x237   :  { %v719_v9 = vmul.f32 %v604_v59, %v1107_v13 }
 0x238   :  { %v608_v8 = vmul.f32 0.5, %v607_v7 }
 0x239   :  { %v735_v10 = vpack.c.bf16 %v719_v9, %v719_v9 }
 0x23a   :  { %v609_v11 = vsub.f32 1.5, %v608_v8  ;;  %v514_v12 = vpop.xlane.xlu1 %513 }
 0x23b   :  { %v846_v14 = vpop.eup %845  ;;  %752 = vst.msk [vmem:[%s1326_s8 + $0x10] sm:$0xf] %vm747_vm8, %v735_v10  ;;  %v546_v15 = vmax.f32 %v514_v12, 1e-24 }
 0x23c   :  { %v610_v16 = vmul.f32 %v844_v2, %v609_v11  ;;  %v616_v18 = vmul.f32 %v846_v14, %v545_v3  ;;  %vm622_vm3 = vweird.f32 %v846_v14 }
 0x23d   :  { %847 = vrsqrt.f32 %v546_v15  ;;  %vm623_vm10 = vmor %vm621_vm9, %vm622_vm3  ;;  %vm631_vm12 = vweird.f32 %v546_v15 }
 0x23e   :  { %v614_v19 = vsel %vm613_vm7, %v844_v2, %v610_v16  ;;  %v617_v20 = vmul.f32 %v846_v14, %v616_v18 }
 0x23f   :  { %v720_v13 = vmul.f32 %v614_v19, %v1118_v17 }
 0x240   :  { %v618_v23 = vmul.f32 0.5, %v617_v20 }
 0x241   :  { %v736_v24 = vpack.c.bf16 %v720_v13, %v720_v13 }
 0x242   :  { %v619_v25 = vsub.f32 1.5, %v618_v23  ;;  %v517_v27 = vpop.xlane.xlu2 %516 }
 0x243   :  { %v848_v28 = vpop.eup %847  ;;  %753 = vst.msk [vmem:[%s1326_s8 + $0x14] sm:$0xf] %vm747_vm8, %v736_v24  ;;  %v547_v29 = vmax.f32 %v517_v27, 1e-24 }
 0x244   :  { %v620_v31 = vmul.f32 %v846_v14, %v619_v25  ;;  %v626_v61 = vmul.f32 %v848_v28, %v546_v15  ;;  %vm632_vm11 = vweird.f32 %v848_v28 }
 0x245   :  { %849 = vrsqrt.f32 %v547_v29  ;;  %vm633_vm13 = vmor %vm631_vm12, %vm632_vm11  ;;  %vm641_vm15 = vweird.f32 %v547_v29 }
 0x246   :  { %v624_v21 = vsel %vm623_vm10, %v846_v14, %v620_v31  ;;  %v627_v32 = vmul.f32 %v848_v28, %v626_v61 }
 0x247   :  { %v721_v17 = vmul.f32 %v624_v21, %v1129_v22 }
 0x248   :  { %v628_v34 = vmul.f32 0.5, %v627_v32 }
 0x249   :  { %v737_v35 = vpack.c.bf16 %v721_v17, %v721_v17 }
 0x24a   :  { %v629_v36 = vsub.f32 1.5, %v628_v34  ;;  %v520_v38 = vpop.xlane.xlu0 %519 }
 0x24b   :  { %v850_v39 = vpop.eup %849  ;;  %754 = vst.msk [vmem:[%s1326_s8 + $0x18] sm:$0xf] %vm747_vm8, %v737_v35  ;;  %v548_v40 = vmax.f32 %v520_v38, 1e-24 }
 0x24c   :  { %v630_v42 = vmul.f32 %v848_v28, %v629_v36  ;;  %v636_v43 = vmul.f32 %v850_v39, %v547_v29  ;;  %vm642_vm14 = vweird.f32 %v850_v39 }
 0x24d   :  { %851 = vrsqrt.f32 %v548_v40  ;;  %vm643_vm0 = vmor %vm641_vm15, %vm642_vm14  ;;  %vm651_vm2 = vweird.f32 %v548_v40 }
 0x24e   :  { %v634_v44 = vsel %vm633_vm13, %v848_v28, %v630_v42  ;;  %v637_v1 = vmul.f32 %v850_v39, %v636_v43 }
 0x24f   :  { %v722_v22 = vmul.f32 %v634_v44, %v1140_v26 }
 0x250   :  { %v638_v46 = vmul.f32 0.5, %v637_v1 }
 0x251   :  { %v738_v47 = vpack.c.bf16 %v722_v22, %v722_v22 }
 0x252   :  { %v639_v48 = vsub.f32 1.5, %v638_v46  ;;  %v523_v50 = vpop.xlane.xlu1 %522 }
 0x253   :  { %v852_v51 = vpop.eup %851  ;;  %755 = vst.msk [vmem:[%s1326_s8 + $0x1c] sm:$0xf] %vm747_vm8, %v738_v47  ;;  %v549_v52 = vmax.f32 %v523_v50, 1e-24 }
 0x254   :  { %v640_v54 = vmul.f32 %v850_v39, %v639_v48  ;;  %v646_v55 = vmul.f32 %v852_v51, %v548_v40  ;;  %vm652_vm1 = vweird.f32 %v852_v51 }
 0x255   :  { %853 = vrsqrt.f32 %v549_v52  ;;  %vm653_vm4 = vmor %vm651_vm2, %vm652_vm1  ;;  %vm661_vm6 = vweird.f32 %v549_v52 }
 0x256   :  { %v644_v56 = vsel %vm643_vm0, %v850_v39, %v640_v54  ;;  %v647_v57 = vmul.f32 %v852_v51, %v646_v55 }
 0x257   :  { %v723_v26 = vmul.f32 %v644_v56, %v1151_v30 }
 0x258   :  { %v648_v5 = vmul.f32 0.5, %v647_v57 }
 0x259   :  { %v739_v58 = vpack.c.bf16 %v723_v26, %v723_v26 }
 0x25a   :  { %v649_v62 = vsub.f32 1.5, %v648_v5  ;;  %v526_v63 = vpop.xlane.xlu2 %525 }
 0x25b   :  { %v854_v0 = vpop.eup %853  ;;  %756 = vst.msk [vmem:[%s1326_s8 + $0x20] sm:$0xf] %vm747_vm8, %v739_v58  ;;  %v550_v2 = vmax.f32 %v526_v63, 1e-24 }
 0x25c   :  { %v650_v3 = vmul.f32 %v852_v51, %v649_v62  ;;  %v656_v4 = vmul.f32 %v854_v0, %v549_v52  ;;  %vm662_vm5 = vweird.f32 %v854_v0 }
 0x25d   :  { %855 = vrsqrt.f32 %v550_v2  ;;  %vm663_vm7 = vmor %vm661_vm6, %vm662_vm5  ;;  %vm671_vm9 = vweird.f32 %v550_v2 }
 0x25e   :  { %v654_v6 = vsel %vm653_vm4, %v852_v51, %v650_v3  ;;  %v657_v59 = vmul.f32 %v854_v0, %v656_v4 }
 0x25f   :  { %v724_v30 = vmul.f32 %v654_v6, %v1162_v33 }
 0x260   :  { %v658_v7 = vmul.f32 0.5, %v657_v59 }
 0x261   :  { %v740_v9 = vpack.c.bf16 %v724_v30, %v724_v30 }
 0x262   :  { %v659_v8 = vsub.f32 1.5, %v658_v7 }
 0x263   :  { %v856_v10 = vpop.eup %855  ;;  %757 = vst.msk [vmem:[%s1326_s8 + $0x24] sm:$0xf] %vm747_vm8, %v740_v9 }
 0x264   :  { %v660_v11 = vmul.f32 %v854_v0, %v659_v8  ;;  %v666_v12 = vmul.f32 %v856_v10, %v550_v2  ;;  %vm672_vm3 = vweird.f32 %v856_v10 }
 0x265   :  { %vm673_vm10 = vmor %vm671_vm9, %vm672_vm3 }
 0x266   :  { %v664_v14 = vsel %vm663_vm7, %v854_v0, %v660_v11  ;;  %v667_v15 = vmul.f32 %v856_v10, %v666_v12 }
 0x267   :  { %v725_v16 = vmul.f32 %v664_v14, %v1173_v37 }
 0x268   :  { %v668_v18 = vmul.f32 0.5, %v667_v15  ;;  %v529_v33 = vpop.xlane.xlu0 %528 }
 0x269   :  { %v741_v19 = vpack.c.bf16 %v725_v16, %v725_v16  ;;  %v551_v20 = vmax.f32 %v529_v33, 1e-24 }
 0x26a   :  { %v669_v13 = vsub.f32 1.5, %v668_v18 }
 0x26b   :  { %758 = vst.msk [vmem:[%s1326_s8 + $0x28] sm:$0xf] %vm747_vm8, %v741_v19  ;;  %857 = vrsqrt.f32 %v551_v20  ;;  %vm681_vm12 = vweird.f32 %v551_v20 }
 0x26c   :  { %v670_v23 = vmul.f32 %v856_v10, %v669_v13 }
 0x26e   :  { %v674_v24 = vsel %vm673_vm10, %v856_v10, %v670_v23 }
 0x26f   :  { %v726_v25 = vmul.f32 %v674_v24, %v1184_v41 }
 0x270   :  { %v532_v27 = vpop.xlane.xlu1 %531 }
 0x271   :  { %v858_v37 = vpop.eup %857  ;;  %v742_v28 = vpack.c.bf16 %v726_v25, %v726_v25  ;;  %v552_v29 = vmax.f32 %v532_v27, 1e-24 }
 0x272   :  { %v676_v31 = vmul.f32 %v858_v37, %v551_v20  ;;  %vm682_vm11 = vweird.f32 %v858_v37 }
 0x273   :  { %759 = vst.msk [vmem:[%s1326_s8 + $0x2c] sm:$0xf] %vm747_vm8, %v742_v28  ;;  %859 = vrsqrt.f32 %v552_v29  ;;  %vm683_vm13 = vmor %vm681_vm12, %vm682_vm11  ;;  %vm691_vm15 = vweird.f32 %v552_v29 }
 0x274   :  { %v677_v61 = vmul.f32 %v858_v37, %v676_v31 }
 0x276   :  { %v678_v21 = vmul.f32 0.5, %v677_v61 }
 0x278   :  { %v679_v32 = vsub.f32 1.5, %v678_v21  ;;  %v535_v17 = vpop.xlane.xlu2 %534 }
 0x279   :  { %v860_v34 = vpop.eup %859  ;;  %v553_v35 = vmax.f32 %v535_v17, 1e-24 }
 0x27a   :  { %v680_v36 = vmul.f32 %v858_v37, %v679_v32  ;;  %v686_v41 = vmul.f32 %v860_v34, %v552_v29  ;;  %vm692_vm14 = vweird.f32 %v860_v34 }
 0x27b   :  { %861 = vrsqrt.f32 %v553_v35  ;;  %vm693_vm0 = vmor %vm691_vm15, %vm692_vm14  ;;  %vm701_vm2 = vweird.f32 %v553_v35 }
 0x27c   :  { %v684_v38 = vsel %vm683_vm13, %v858_v37, %v680_v36  ;;  %v687_v39 = vmul.f32 %v860_v34, %v686_v41 }
 0x27d   :  { %v727_v40 = vmul.f32 %v684_v38, %v1195_v45 }
 0x27e   :  { %v688_v42 = vmul.f32 0.5, %v687_v39 }
 0x27f   :  { %v743_v43 = vpack.c.bf16 %v727_v40, %v727_v40 }
 0x280   :  { %v689_v44 = vsub.f32 1.5, %v688_v42  ;;  %v538_v1 = vpop.xlane.xlu0 %537 }
 0x281   :  { %v862_v22 = vpop.eup %861  ;;  %760 = vst.msk [vmem:[%s1326_s8 + $0x30] sm:$0xf] %vm747_vm8, %v743_v43  ;;  %v554_v46 = vmax.f32 %v538_v1, 1e-24 }
 0x282   :  { %v690_v47 = vmul.f32 %v860_v34, %v689_v44  ;;  %v696_v48 = vmul.f32 %v862_v22, %v553_v35  ;;  %vm702_vm1 = vweird.f32 %v862_v22 }
 0x283   :  { %863 = vrsqrt.f32 %v554_v46  ;;  %vm703_vm4 = vmor %vm701_vm2, %vm702_vm1  ;;  %vm711_vm6 = vweird.f32 %v554_v46 }
 0x284   :  { %v694_v50 = vsel %vm693_vm0, %v860_v34, %v690_v47  ;;  %v697_v51 = vmul.f32 %v862_v22, %v696_v48 }
 0x285   :  { %v728_v45 = vmul.f32 %v694_v50, %v1206_v49 }
 0x286   :  { %v698_v52 = vmul.f32 0.5, %v697_v51 }
 0x287   :  { %v744_v54 = vpack.c.bf16 %v728_v45, %v728_v45 }
 0x288   :  { %v699_v55 = vsub.f32 1.5, %v698_v52 }
 0x289   :  { %v864_v56 = vpop.eup %863  ;;  %761 = vst.msk [vmem:[%s1326_s8 + $0x34] sm:$0xf] %vm747_vm8, %v744_v54 }
 0x28a   :  { %v700_v57 = vmul.f32 %v862_v22, %v699_v55  ;;  %v706_v26 = vmul.f32 %v864_v56, %v554_v46  ;;  %vm712_vm5 = vweird.f32 %v864_v56 }
 0x28b   :  { %vm713_vm7 = vmor %vm711_vm6, %vm712_vm5 }
 0x28c   :  { %v704_v5 = vsel %vm703_vm4, %v862_v22, %v700_v57  ;;  %v707_v58 = vmul.f32 %v864_v56, %v706_v26 }
 0x28d   :  { %v729_v62 = vmul.f32 %v704_v5, %v1217_v53 }
 0x28e   :  { %v708_v63 = vmul.f32 0.5, %v707_v58 }
 0x28f   :  { %v745_v49 = vpack.c.bf16 %v729_v62, %v729_v62 }
 0x290   :  { %v709_v0 = vsub.f32 1.5, %v708_v63 }
 0x291   :  { %762 = vst.msk [vmem:[%s1326_s8 + $0x38] sm:$0xf] %vm747_vm8, %v745_v49 }
 0x292   :  { %v710_v2 = vmul.f32 %v864_v56, %v709_v0 }
 0x294   :  { %v714_v3 = vsel %vm713_vm7, %v864_v56, %v710_v2 }
 0x295   :  { %v730_v4 = vmul.f32 %v714_v3, %v1228_v60 }
 0x297   :  { %v746_v6 = vpack.c.bf16 %v730_v4, %v730_v4 }
 0x299   :  { %763 = vst.msk [vmem:[%s1326_s8 + $0x3c] sm:$0xf] %vm747_vm8, %v746_v6 }

</bundles_post_ra>
